<compile_context>
chip_gen: v7x
topology: tpu7x:2x2x1
jax: 0.10.0
libtpu: 0.0.40
codegen_flags: <defaults>
</compile_context>

<pallas_src>
import math
import numpy as np

import jax
import jax.numpy as jnp
from jax.experimental import pallas as pl
from jax.experimental.pallas import tpu as pltpu

# --------------------------------------------------------------------------- #
# Constants matching the PyTorch module
# --------------------------------------------------------------------------- #
_WINDOW_SIZE = 11
_SIGMA = 1.5
_C1 = 0.01 ** 2
_C2 = 0.03 ** 2
_EDGE_KERNELS = np.array(
    [
        [[0, -1, 0], [-1, 4, -1], [0, -1, 0]],
        [[-1, -1, -1], [-1, 8, -1], [-1, -1, -1]],
        [[1, -2, 1], [-2, 4, -2], [1, -2, 1]],
    ],
    dtype=np.float32,
)

_OUT_LANES = 128                      # lane-dense per-image partial-result row

# L1 kernel tuning (perf review: 2-4 MiB tiles, 32-row rounding, explicit VMEM cap).
_L1_TARGET_TILE_BYTES = 4 << 20
_L1_NUM_SHARDS = 2                    # v7x: both TensorCores; masked no-op on 1-TC chips
_L1_VMEM_LIMIT_BYTES = 32 << 20

# SSIM/edge kernel VMEM budget, sized for v7x's 64 MiB physical VMEM.
_SSIM_VMEM_LIMIT_BYTES = 60 << 20
_SSIM_VMEM_BUDGET_BYTES = 56 << 20


def _round_up(x, m):
    return ((x + m - 1) // m) * m


def _cdiv(a, b):
    return -(-a // b)


# --------------------------------------------------------------------------- #
# Host-side constant matrices (Gaussian band + nearest-neighbour band)
# --------------------------------------------------------------------------- #
def _gaussian_1d(window_size=_WINDOW_SIZE, sigma=_SIGMA):
    g = np.array(
        [math.exp(-((x - window_size // 2) ** 2) / (2.0 * sigma ** 2))
         for x in range(window_size)],
        dtype=np.float32,
    )
    return (g / g.sum()).astype(np.float32)


def _gauss_band(n):
    # M[i, j] = g[j - i + 5] for |j - i| <= 5  (zero-padded "same" conv as a matmul)
    g = _gaussian_1d()
    half = _WINDOW_SIZE // 2
    m = np.zeros((n, n), np.float32)
    for d in range(-half, half + 1):
        m += g[d + half] * np.eye(n, k=d, dtype=np.float32)
    return m


def _neighbor_band(n):
    # +/-1 off-diagonal: (x @ N)[i, j] = x[i, j-1] + x[i, j+1] (zero pad);
    # (N @ x)[i, j]     = x[i-1, j] + x[i+1, j].
    return (np.eye(n, k=1, dtype=np.float32) + np.eye(n, k=-1, dtype=np.float32))


def _ssim_vmem_estimate(h, w, itemsize):
    const_bytes = 2 * (2 * h * h + 2 * w * w) * 4   # gv/mv + gh/nh, double-buffered f32
    img_bytes = 2 * 2 * h * w * itemsize            # sr + hr blocks, double-buffered
    live_bytes = 20 * h * w * 4                     # live f32 intermediates (approx)
    return const_bytes + img_bytes + live_bytes


# --------------------------------------------------------------------------- #
# Kernel 1: L1 loss (streaming, sharded, vector accumulator)
# --------------------------------------------------------------------------- #
def _make_l1_kernel(rows, block_rows, lanes, steps):
    def kernel(a_ref, b_ref, out_ref):
        s = pl.program_id(0)   # shard axis ("parallel")
        j = pl.program_id(1)   # reduction axis ("arbitrary")

        @pl.when(j == 0)
        def _():
            out_ref[...] = jnp.zeros_like(out_ref)

        # Native-dtype DMA, cast in VMEM (free under the memory bottleneck).
        d = jnp.abs(a_ref[...].astype(jnp.float32) - b_ref[...].astype(jnp.float32))

        blk = s * steps + j
        is_full = (blk + 1) * block_rows <= rows   # whole tile inside the slab?

        # Interior tiles: plain unmasked reduction (no iota/compare/where VPU work).
        @pl.when(is_full)
        def _():
            out_ref[...] += jnp.sum(d, axis=0, keepdims=True).reshape(1, 1, lanes)

        # Tail (or clamped out-of-range shard step): mask rows past the slab end.
        @pl.when(jnp.logical_not(is_full))
        def _():
            rid = (jax.lax.broadcasted_iota(jnp.int32, (block_rows, lanes), 0)
                   + blk * block_rows)
            dm = jnp.where(rid < rows, d, 0.0)
            out_ref[...] += jnp.sum(dm, axis=0, keepdims=True).reshape(1, 1, lanes)

    return kernel


def _l1_loss_pallas(x, y):
    assert x.shape == y.shape
    n = x.size
    a = x.reshape(-1)
    b = y.reshape(-1)

    # Widest lane count dividing n -> lane-dense slab with no padding copy.
    lanes = 128
    for cand in (1024, 512, 256):
        if n % cand == 0:
            lanes = cand
            break
    if n % lanes != 0:
        # Rare ragged case: zero padding contributes |0 - 0| = 0; mean still uses true n.
        pad = (-n) % lanes
        a = jnp.pad(a, (0, pad))
        b = jnp.pad(b, (0, pad))

    rows = a.shape[0] // lanes
    a2 = a.reshape(rows, lanes)
    b2 = b.reshape(rows, lanes)

    itemsize = x.dtype.itemsize
    # 32-row multiple keeps bf16 / int8 / fp8 tiles layout-native (packed sublanes).
    block_rows = max(32, (_L1_TARGET_TILE_BYTES // (lanes * itemsize)) // 32 * 32)
    block_rows = min(block_rows, _round_up(rows, 32))

    total_blocks = _cdiv(rows, block_rows)
    steps = _cdiv(total_blocks, _L1_NUM_SHARDS)

    def in_map(s, j):
        # Clamp so out-of-range shard steps re-read the last block; their
        # contribution is masked to zero in-kernel via the global row index.
        blk = jnp.minimum(s * steps + j, total_blocks - 1)
        return (blk, 0)

    partials = pl.pallas_call(
        _make_l1_kernel(rows, block_rows, lanes, steps),
        out_shape=jax.ShapeDtypeStruct((_L1_NUM_SHARDS, 1, lanes), jnp.float32),
        grid_spec=pltpu.PrefetchScalarGridSpec(
            num_scalar_prefetch=0,
            grid=(_L1_NUM_SHARDS, steps),
            in_specs=[
                pl.BlockSpec((block_rows, lanes), in_map),
                pl.BlockSpec((block_rows, lanes), in_map),
            ],
            out_specs=pl.BlockSpec((1, 1, lanes), lambda s, j: (s, 0, 0)),
        ),
        compiler_params=pltpu.CompilerParams(
            dimension_semantics=("parallel", "arbitrary"),
            vmem_limit_bytes=_L1_VMEM_LIMIT_BYTES),
    )(a2, b2)

    return jnp.sum(partials) / float(n)


# --------------------------------------------------------------------------- #
# Kernel 2: per-image SSIM-map sum + squared-edge-difference sums
# --------------------------------------------------------------------------- #
def _ssim_edge_kernel(sr_ref, hr_ref, gv_ref, gh_ref, mv_ref, nh_ref, out_ref):
    x = sr_ref[0].astype(jnp.float32)   # (H, W)
    y = hr_ref[0].astype(jnp.float32)
    gv = gv_ref[...]                    # (H, H) Gaussian band (vertical pass)
    gh = gh_ref[...]                    # (W, W) Gaussian band (horizontal pass)
    mv = mv_ref[...]                    # (H, H) +/-1 off-diagonals (vertical neighbours)
    nh = nh_ref[...]                    # (W, W) +/-1 off-diagonals (horizontal neighbours)
    h = x.shape[0]

    def mm(p, q):
        # DEFAULT precision: single bf16 MXU pass, f32 accumulate (perf review).
        return jnp.dot(p, q, preferred_element_type=jnp.float32)

    # ---- SSIM: separable 11x11 Gaussian "same" conv as banded matmuls ----------
    # Batch the five streams through the horizontal pass as one (5H,W)@(W,W) matmul
    # (sublane-axis stack; vertical pass stays per-stream to avoid lane-axis concat).
    streams = (x, y, x * x, y * y, x * y)
    if h % 8 == 0:
        stacked = jnp.concatenate(streams, axis=0)                # (5H, W)
        hp = mm(stacked, gh)
        hps = [hp[k * h:(k + 1) * h, :] for k in range(5)]        # aligned sublane slices
    else:
        hps = [mm(t, gh) for t in streams]
    mu1, mu2, e_xx, e_yy, e_xy = [mm(gv, t) for t in hps]         # vertical passes

    mu1_sq = mu1 * mu1
    mu2_sq = mu2 * mu2
    mu1_mu2 = mu1 * mu2
    sigma1_sq = e_xx - mu1_sq
    sigma2_sq = e_yy - mu2_sq
    sigma12 = e_xy - mu1_mu2
    num = (2.0 * mu1_mu2 + _C1) * (2.0 * sigma12 + _C2)
    den = (mu1_sq + mu2_sq + _C1) * (sigma1_sq + sigma2_sq + _C2)
    ssim_sum = jnp.sum(num / den)

    # ---- Edge loss: all three 3x3 convs from 3 shared neighbour-sum matmuls ----
    # conv_k(sr) - conv_k(hr) == conv_k(sr - hr)  (convolution is linear).
    d = x - y
    n = mm(d, nh)        # left + right neighbours
    m = mm(mv, d)        # up + down neighbours
    mn = mm(mv, n)       # four diagonal neighbours
    conv1 = 4.0 * d - n - m
    conv2 = 8.0 * d - n - m - mn
    conv3 = 4.0 * d - 2.0 * n - 2.0 * m + mn
    e1 = jnp.sum(conv1 * conv1)
    e2 = jnp.sum(conv2 * conv2)
    e3 = jnp.sum(conv3 * conv3)

    lane = jax.lax.broadcasted_iota(jnp.int32, (1, 1, _OUT_LANES), 2)
    row = jnp.where(lane == 0, ssim_sum, 0.0)
    row = row + jnp.where(lane == 1, e1, 0.0)
    row = row + jnp.where(lane == 2, e2, 0.0)
    row = row + jnp.where(lane == 3, e3, 0.0)
    out_ref[...] = row


def _ssim_edge_partials(sr, hr):
    N, C, H, W = sr.shape
    nc = N * C
    sr3 = sr.reshape(nc, H, W)
    hr3 = hr.reshape(nc, H, W)

    est = _ssim_vmem_estimate(H, W, sr.dtype.itemsize)
    # TODO(synk): spatial tiling with a 5-pixel halo (roll/FMA Gaussian crossover) for
    # images whose whole-image footprint exceeds the v7x 64 MiB VMEM budget.
    assert est <= _SSIM_VMEM_BUDGET_BYTES, (
        f"H={H}, W={W} needs ~{est / 2**20:.1f} MiB VMEM; whole-image SSIM kernel "
        "requires halo tiling at this size")

    gv = jnp.asarray(_gauss_band(H))
    gh = jnp.asarray(_gauss_band(W))
    mv = jnp.asarray(_neighbor_band(H))
    nh = jnp.asarray(_neighbor_band(W))

    # TODO(synk): constant operands (gv/gh/mv/nh) still double-buffer by default;
    # single-buffering them (pipeline_mode) would halve their VMEM footprint.
    # TODO(synk): when N*C == 1, add a second "parallel" grid axis (spatial halves
    # with a halo) so both v7x TensorCores get work.
    out = pl.pallas_call(
        _ssim_edge_kernel,
        out_shape=jax.ShapeDtypeStruct((nc, 1, _OUT_LANES), jnp.float32),
        grid_spec=pltpu.PrefetchScalarGridSpec(
            num_scalar_prefetch=0,
            grid=(nc,),
            in_specs=[
                pl.BlockSpec((1, H, W), lambda i: (i, 0, 0)),
                pl.BlockSpec((1, H, W), lambda i: (i, 0, 0)),
                pl.BlockSpec((H, H), lambda i: (0, 0)),
                pl.BlockSpec((W, W), lambda i: (0, 0)),
                pl.BlockSpec((H, H), lambda i: (0, 0)),
                pl.BlockSpec((W, W), lambda i: (0, 0)),
            ],
            out_specs=pl.BlockSpec((1, 1, _OUT_LANES), lambda i: (i, 0, 0)),
        ),
        compiler_params=pltpu.CompilerParams(
            dimension_semantics=("parallel",),
            vmem_limit_bytes=_SSIM_VMEM_LIMIT_BYTES),
    )(sr3, hr3, gv, gh, mv, nh)

    parts = out.reshape(nc, _OUT_LANES)
    ssim_sum = jnp.sum(parts[:, 0])
    edge_sq_sums = jnp.sum(parts[:, 1:4], axis=0)   # (3,)
    return ssim_sum, edge_sq_sums


# --------------------------------------------------------------------------- #
# CombinedLoss forward
# --------------------------------------------------------------------------- #
def combined_loss(sr, hr, l1_weight=1.0, ssim_weight=0.1, celoss_weight=0.1):
    N, C, H, W = sr.shape
    denom = float(N * C * H * W)

    l1 = _l1_loss_pallas(sr, hr)
    ssim_sum, edge_sq = _ssim_edge_partials(sr, hr)

    ssim_loss = 1.0 - ssim_sum / denom
    edge_loss = celoss_weight * (jnp.sum(edge_sq) / denom)
    return l1_weight * l1 + ssim_weight * ssim_loss + edge_loss


# --------------------------------------------------------------------------- #
# Pure-JAX reference (for correctness check only)
# --------------------------------------------------------------------------- #
def _reference_combined_loss(sr, hr, l1_weight=1.0, ssim_weight=0.1, celoss_weight=0.1):
    sr = sr.astype(jnp.float32)
    hr = hr.astype(jnp.float32)
    _, c, _, _ = sr.shape
    hp = jax.lax.Precision.HIGHEST

    def dconv(imgs, wgt, pad):
        return jax.lax.conv_general_dilated(
            imgs, wgt, window_strides=(1, 1), padding=[(pad, pad), (pad, pad)],
            dimension_numbers=("NCHW", "OIHW", "NCHW"),
            feature_group_count=c, precision=hp)

    l1 = jnp.mean(jnp.abs(sr - hr))

    g = _gaussian_1d()
    win = np.outer(g, g).astype(np.float32)
    wgt = jnp.asarray(np.broadcast_to(win[None, None], (c, 1, _WINDOW_SIZE, _WINDOW_SIZE)).copy())
    mu1 = dconv(sr, wgt, 5)
    mu2 = dconv(hr, wgt, 5)
    mu1_sq, mu2_sq, mu1_mu2 = mu1 * mu1, mu2 * mu2, mu1 * mu2
    s1 = dconv(sr * sr, wgt, 5) - mu1_sq
    s2 = dconv(hr * hr, wgt, 5) - mu2_sq
    s12 = dconv(sr * hr, wgt, 5) - mu1_mu2
    ssim_map = ((2 * mu1_mu2 + _C1) * (2 * s12 + _C2)) / (
        (mu1_sq + mu2_sq + _C1) * (s1 + s2 + _C2))
    ssim_loss = 1.0 - jnp.mean(ssim_map)

    edge = 0.0
    for k in range(3):
        wk = jnp.asarray(np.broadcast_to(_EDGE_KERNELS[k][None, None], (c, 1, 3, 3)).copy())
        edge = edge + jnp.mean((dconv(sr, wk, 1) - dconv(hr, wk, 1)) ** 2)

    return l1_weight * l1 + ssim_weight * ssim_loss + celoss_weight * edge


if __name__ == "__main__":
    key = jax.random.PRNGKey(0)
    k1, k2 = jax.random.split(key)
    # C=1: the ContrastiveEdgeLoss conv weights are (1,1,3,3), so (like PyTorch) the
    # edge term only accepts single-channel images.
    shape = (2, 1, 16, 16)
    sr = jax.random.normal(k1, shape, dtype=jnp.float32)
    hr = jax.random.normal(k2, shape, dtype=jnp.float32)

    loss = jax.block_until_ready(combined_loss(sr, hr))
    ref = jax.block_until_ready(_reference_combined_loss(sr, hr))

    assert bool(jnp.isfinite(loss)), loss
    assert jnp.allclose(loss, ref, rtol=1e-2, atol=1e-3), (loss, ref)
    print("KERNEL_OK")
</pallas_src>

<mosaic_0001>
module attributes {stable_mosaic.version = 11 : i64} {
  func.func @kernel(%arg0: i32, %arg1: i32, %arg2: memref<32x512xf32, #tpu.memory_space<vmem>>, %arg3: memref<32x512xf32, #tpu.memory_space<vmem>>, %arg4: memref<1x1x512xf32, #tpu.memory_space<vmem>>) attributes {dimension_semantics = [#tpu.dimension_semantics<parallel>, #tpu.dimension_semantics<arbitrary>], iteration_bounds = array<i64: 2, 1>, scalar_prefetch = 0 : i64, scratch_operands = 0 : i64, tpu.core_type = #tpu.core_type<tc>, window_params = [{transform_indices = @transform_0, window_bounds = array<i64: 32, 512>}, {transform_indices = @transform_1, window_bounds = array<i64: 32, 512>}, {transform_indices = @transform_2, window_bounds = array<i64: 1, 1, 512>}]} {
    %c0_i32 = arith.constant 0 : i32
    %0 = arith.cmpi eq, %arg1, %c0_i32 : i32
    %1 = arith.extui %0 : i1 to i32
    %c0_i32_0 = arith.constant 0 : i32
    %2 = arith.cmpi ne, %1, %c0_i32_0 : i32
    scf.if %2 {
      %cst = arith.constant 0.000000e+00 : f32
      %17 = vector.broadcast %cst : f32 to vector<1x1x512xf32>
      %c0_8 = arith.constant 0 : index
      %c0_9 = arith.constant 0 : index
      %c0_10 = arith.constant 0 : index
      %18 = vector.load %arg4[%c0_8, %c0_9, %c0_10] : memref<1x1x512xf32, #tpu.memory_space<vmem>>, vector<1x1x512xf32>
      tpu.vector_store %arg4[%c0_8, %c0_9, %c0_10], %17 {strides = array<i32>} : memref<1x1x512xf32, #tpu.memory_space<vmem>>, vector<1x1x512xf32>,
    } else {
    }
    %c0 = arith.constant 0 : index
    %c0_1 = arith.constant 0 : index
    %3 = vector.load %arg2[%c0, %c0_1] : memref<32x512xf32, #tpu.memory_space<vmem>>, vector<32x512xf32>
    %c0_2 = arith.constant 0 : index
    %c0_3 = arith.constant 0 : index
    %4 = vector.load %arg3[%c0_2, %c0_3] : memref<32x512xf32, #tpu.memory_space<vmem>>, vector<32x512xf32>
    %5 = arith.subf %3, %4 : vector<32x512xf32>
    %6 = math.absf %5 : vector<32x512xf32>
    %c1_i32 = arith.constant 1 : i32
    %7 = arith.muli %arg0, %c1_i32 : i32
    %8 = arith.addi %7, %arg1 : i32
    %c1_i32_4 = arith.constant 1 : i32
    %9 = arith.addi %8, %c1_i32_4 : i32
    %c32_i32 = arith.constant 32 : i32
    %10 = arith.muli %9, %c32_i32 : i32
    %c1_i32_5 = arith.constant 1 : i32
    %11 = arith.cmpi sle, %10, %c1_i32_5 : i32
    %12 = arith.extui %11 : i1 to i32
    %c0_i32_6 = arith.constant 0 : i32
    %13 = arith.cmpi ne, %12, %c0_i32_6 : i32
    scf.if %13 {
      %c0_8 = arith.constant 0 : index
      %c0_9 = arith.constant 0 : index
      %c0_10 = arith.constant 0 : index
      %17 = vector.load %arg4[%c0_8, %c0_9, %c0_10] : memref<1x1x512xf32, #tpu.memory_space<vmem>>, vector<1x1x512xf32>
      %cst = arith.constant dense<0.000000e+00> : vector<512xf32>
      %18 = vector.multi_reduction <add>, %6, %cst [0] : vector<32x512xf32> to vector<512xf32>
      %19 = vector.shape_cast %18 : vector<512xf32> to vector<1x512xf32>
      %20 = vector.shape_cast %19 : vector<1x512xf32> to vector<1x1x512xf32>
      %21 = arith.addf %17, %20 : vector<1x1x512xf32>
      %c0_11 = arith.constant 0 : index
      %c0_12 = arith.constant 0 : index
      %c0_13 = arith.constant 0 : index
      %22 = vector.load %arg4[%c0_11, %c0_12, %c0_13] : memref<1x1x512xf32, #tpu.memory_space<vmem>>, vector<1x1x512xf32>
      tpu.vector_store %arg4[%c0_11, %c0_12, %c0_13], %21 {strides = array<i32>} : memref<1x1x512xf32, #tpu.memory_space<vmem>>, vector<1x1x512xf32>,
    } else {
    }
    %true = arith.constant true
    %14 = arith.xori %11, %true : i1
    %15 = arith.extui %14 : i1 to i32
    %c0_i32_7 = arith.constant 0 : i32
    %16 = arith.cmpi ne, %15, %c0_i32_7 : i32
    scf.if %16 {
      %17 = tpu.iota {dimensions = array<i32: 0>} : vector<32x512xi32>
      %c32_i32_8 = arith.constant 32 : i32
      %18 = arith.muli %8, %c32_i32_8 : i32
      %19 = vector.broadcast %18 : i32 to vector<32x512xi32>
      %20 = arith.addi %17, %19 : vector<32x512xi32>
      %c1_i32_9 = arith.constant 1 : i32
      %21 = vector.broadcast %c1_i32_9 : i32 to vector<32x512xi32>
      %22 = arith.cmpi slt, %20, %21 : vector<32x512xi32>
      %cst = arith.constant 0.000000e+00 : f32
      %23 = vector.broadcast %cst : f32 to vector<32x512xf32>
      %24 = arith.select %22, %6, %23 : vector<32x512xi1>, vector<32x512xf32>
      %c0_10 = arith.constant 0 : index
      %c0_11 = arith.constant 0 : index
      %c0_12 = arith.constant 0 : index
      %25 = vector.load %arg4[%c0_10, %c0_11, %c0_12] : memref<1x1x512xf32, #tpu.memory_space<vmem>>, vector<1x1x512xf32>
      %cst_13 = arith.constant dense<0.000000e+00> : vector<512xf32>
      %26 = vector.multi_reduction <add>, %24, %cst_13 [0] : vector<32x512xf32> to vector<512xf32>
      %27 = vector.shape_cast %26 : vector<512xf32> to vector<1x512xf32>
      %28 = vector.shape_cast %27 : vector<1x512xf32> to vector<1x1x512xf32>
      %29 = arith.addf %25, %28 : vector<1x1x512xf32>
      %c0_14 = arith.constant 0 : index
      %c0_15 = arith.constant 0 : index
      %c0_16 = arith.constant 0 : index
      %30 = vector.load %arg4[%c0_14, %c0_15, %c0_16] : memref<1x1x512xf32, #tpu.memory_space<vmem>>, vector<1x1x512xf32>
      tpu.vector_store %arg4[%c0_14, %c0_15, %c0_16], %29 {strides = array<i32>} : memref<1x1x512xf32, #tpu.memory_space<vmem>>, vector<1x1x512xf32>,
    } else {
    }
    return
  }
  func.func @transform_0(%arg0: i32, %arg1: i32) -> (i32, i32) {
    %c1_i32 = arith.constant 1 : i32
    %0 = arith.muli %arg0, %c1_i32 : i32
    %1 = arith.addi %0, %arg1 : i32
    %c0_i32 = arith.constant 0 : i32
    %2 = arith.minsi %1, %c0_i32 : i32
    %c0_i32_0 = arith.constant 0 : i32
    %c0_i32_1 = arith.constant 0 : i32
    return %2, %c0_i32_0 : i32, i32
  }
  func.func @transform_1(%arg0: i32, %arg1: i32) -> (i32, i32) {
    %c1_i32 = arith.constant 1 : i32
    %0 = arith.muli %arg0, %c1_i32 : i32
    %1 = arith.addi %0, %arg1 : i32
    %c0_i32 = arith.constant 0 : i32
    %2 = arith.minsi %1, %c0_i32 : i32
    %c0_i32_0 = arith.constant 0 : i32
    %c0_i32_1 = arith.constant 0 : i32
    return %2, %c0_i32_0 : i32, i32
  }
  func.func @transform_2(%arg0: i32, %arg1: i32) -> (i32, i32, i32) {
    %c0_i32 = arith.constant 0 : i32
    %c0_i32_0 = arith.constant 0 : i32
    %c0_i32_1 = arith.constant 0 : i32
    return %arg0, %c0_i32, %c0_i32_0 : i32, i32, i32
  }
}

</mosaic_0001>

<bundles_post_ra>
// kernel: tpu_custom_call.1
= control target key start
LH: loop header
LB: loop body
LE: loop exit
PB: predicated region body
PF: predicated region fallthrough
CT: control target
= control target key end

     0   :  { %7 = vsyncpa [#allocation3], 0  ;;  %s2313_s0 = inlined_call_operand.hbm [shape: f32[1,512], index: 0, kind: input, shape index: {}]   ;;  %s2314_s1 = inlined_call_operand.hbm [shape: f32[1,512], index: 1, kind: input, shape index: {}]   ;;  %s2315_s2 = inlined_call_operand.hbm [shape: f32[2,1,512], index: 2, kind: output, shape index: {}]  }
   0x1   :  { %9 = vsyncpa [#allocation3 + $0x1], 0 }
   0x2   :  { %10 = vsyncpa [#allocation6], 0 }
   0x3   :  { %12 = vsyncpa [#allocation6 + $0x1], 0 }
   0x4   :  { %13 = vsyncpa [#allocation4], 0 }
   0x5   :  { %15 = vsyncpa [#allocation4 + $0x1], 0  ;;  %s1663_s9 = smov 0   ;;  %s1665_s10 = smov 0  }
   0x6   :  { %s1667_s11 = smov 0   ;;  %s1669_s12 = smov 0  }
   0x7   :  { %s1671_s13 = smov 0   ;;  %s1673_s14 = smov 0  }
   0x8   :  { %s1675_s15 = smov 0   ;;  %s1677_s16 = smov 0  }
   0x9 LB: > { %s1337_s17 = sadd.s32 4294967295, %s1636_s16   ;;  %s1338_s18 = sadd.s32 4294967294, %s1636_s16   ;;  %s1636_s16 = sphi %s1677_s16, %s21_s16   ;;  %s1632_s15 = sphi %s1675_s15, %s2352_s15   ;;  %s1628_s14 = sphi %s1673_s14, %s2351_s14   ;;  %s1624_s13 = sphi %s1671_s13, %s2303_s13   ;;  %s1620_s12 = sphi %s1669_s12, %s2350_s12   ;;  %s1616_s11 = sphi %s1667_s11, %s2349_s11   ;;  %s1612_s10 = sphi %s1665_s10, %s2348_s10   ;;  %s1608_s9 = sphi %s1663_s9, %s2347_s9  }
   0xa   : > { %s33_s19 = sadd.s32 1, %s1632_s15  ;;  %p1605_p1 = scmp.ne.s32.totalorder %s1624_s13, 0 }
   0xb   : > { %p35_p0 = scmp.ge.s32.totalorder %s33_s19, 2  ;;  %p54_p2 = scmp.eq.s32.totalorder %s1636_s16, 0 }
   0xc   : > { %p59_p3 = scmp.ne.s32.totalorder %s1624_s13, %s1620_s12  ;;  %p60_p5 = scmp.eq.s32.totalorder %s1337_s17, 0 }
   0xd   : > { %s2354_s19 = smov (%p35_p0, %s33_s19), 0  ;;  %p1709_p4 = por %p1605_p1, %p54_p2 }
   0xe   : > { %p1713_p6 = por %p60_p5, %p59_p3  ;;  %s101_s22 = ssub.s32 %s1632_s15, %s2354_s19 }
   0xf   : > { %p102_p7 = scmp.eq.s32.totalorder %s101_s22, 0  ;;  %s104_s23 = sadd.s32 1, %s1616_s11 }
  0x10   : > { %p114_p8 = scmp.ne.s32.totalorder %s1616_s11, %s1612_s10  ;;  %p115_p9 = scmp.eq.s32.totalorder %s1337_s17, 1 }
  0x11   : > { %s1721_s24 = scalar_select %p102_p7, %s1616_s11, %s104_s23  }
  0x12   : > { %p120_p10 = scmp.ne.s32.totalorder %s1612_s10, %s1608_s9  ;;  %p121_p11 = scmp.eq.s32.totalorder %s1338_s18, 1 }
  0x13   : > { %p1727_p12 = por %p115_p9, %p114_p8  ;;  %p2316_p0 = scmp.ge.s32.totalorder %s1636_s16, 2 }
  0x14   : > { %p1731_p13 = por %p121_p11, %p120_p10 }
  0x15   : > { %137 = sbr.rel (%p2316_p0) target bundleno = 82 (0x52), region = 16 }
  0x1c   : > { %140 = sbr.rel (!%p1709_p4) target bundleno = 55 (0x37), region = 20 }
  0x23   : > { %155 = vsyncadd [#allocation3], 1984  ;;  %s1638_s27 = smov [#allocation2]   ;;  %s1469_s3 = scalar_lea.hbm %s2313_s0, 64 }
  0x24   : > { %s161_s28 = sshll.u32 %s1638_s27, 4  ;;  %p1470_p1 = scmp.ne.s32.totalorder %s2313_s0, %s1469_s3  ;;  %s162_s28 = int_to_ptr.vmem [resolvable:$true] %s161_s28 }
  0x25   : > { %p1475_p2 = scmp.lt.u32.totalorder %s1469_s3, %s1469_s3  ;;  %p1477_p3 = scmp.lt.u32.totalorder %s1469_s3, %s2313_s0 }
  0x27   : > { %p1478_p5 = por %p1477_p3, %p1475_p2 }
  0x29   : > { %p1479_p7 = pnand %p1478_p5, %p1470_p1 }
  0x2b   : > { %1482 = shalt.err (!%p1479_p7)
}
  0x2c   : > { %s1483_s8 = scalar_lea.vmem %s162_s28, 64  ;;  %s1489_s12 = scalar_lea.vmem %s162_s28, 4096 }
  0x2d   : > { %p1484_p8 = scmp.ne.s32.totalorder %s162_s28, %s1483_s8  ;;  %p1490_p9 = scmp.lt.s32.totalorder %s162_s28, %s162_s28 }
  0x2e   : > { %p1491_p10 = scmp.lt.s32.totalorder %s1489_s12, %s1483_s8 }
  0x30   : > { %p1492_p11 = por %p1491_p10, %p1490_p9 }
  0x32   : > { %p1493_p0 = pnand %p1492_p11, %p1484_p8 }
  0x34   : > { %1496 = shalt.err (!%p1493_p0)
}
  0x35   : > { %s1639_s17 = smov 64   ;;  %s1640_s18 = smov 4  }
  0x36   : > { %167 = dma.hbm_to_vmem [thread:$0]  %s2313_s0, 64, %s162_s28, [#allocation3], %s1639_s17, %s1639_s17, %s1640_s18  }
  0x37 PF: > { %170 = sbr.rel (!%p1709_p4) target bundleno = 82 (0x52), region = 24 }
  0x3e   : > { %185 = vsyncadd [#allocation6], 1984  ;;  %s1641_s27 = smov [#allocation5]   ;;  %s1497_s4 = scalar_lea.hbm %s2314_s1, 64 }
  0x3f   : > { %s191_s29 = sshll.u32 %s1641_s27, 4  ;;  %p1498_p0 = scmp.ne.s32.totalorder %s2314_s1, %s1497_s4  ;;  %s192_s29 = int_to_ptr.vmem [resolvable:$true] %s191_s29 }
  0x40   : > { %p1503_p1 = scmp.lt.u32.totalorder %s1497_s4, %s1497_s4  ;;  %p1505_p2 = scmp.lt.u32.totalorder %s1497_s4, %s2314_s1 }
  0x42   : > { %p1506_p3 = por %p1505_p2, %p1503_p1 }
  0x44   : > { %p1507_p5 = pnand %p1506_p3, %p1498_p0 }
  0x46   : > { %1510 = shalt.err (!%p1507_p5)
}
  0x47   : > { %s1511_s20 = scalar_lea.vmem %s192_s29, 64  ;;  %s1517_s28 = scalar_lea.vmem %s192_s29, 4096 }
  0x48   : > { %p1512_p4 = scmp.ne.s32.totalorder %s192_s29, %s1511_s20  ;;  %p1518_p7 = scmp.lt.s32.totalorder %s192_s29, %s192_s29 }
  0x49   : > { %p1519_p8 = scmp.lt.s32.totalorder %s1517_s28, %s1511_s20 }
  0x4b   : > { %p1520_p9 = por %p1519_p8, %p1518_p7 }
  0x4d   : > { %p1521_p10 = pnand %p1520_p9, %p1512_p4 }
  0x4f   : > { %1524 = shalt.err (!%p1521_p10)
}
  0x50   : > { %s1642_s12 = smov 64   ;;  %s1643_s17 = smov 4  }
  0x51   : > { %197 = dma.hbm_to_vmem [thread:$0]  %s2314_s1, 64, %s192_s29, [#allocation6], %s1642_s12, %s1642_s12, %s1643_s17  }
  0x52 PF: > { %p1359_p11 = scmp.ge.s32.totalorder %s1636_s16, 1  ;;  %p199_p0 = scmp.lt.s32.totalorder %s1636_s16, 3 }
  0x54   : > { %p200_p1 = pnand %p1359_p11, %p199_p0 }
  0x56   : > { %203 = sbr.rel (%p200_p1) target bundleno = 268 (0x10c), region = 28 }
  0x5d   : > { %s205_s23 = sand.u32 1, %s1624_s13  }
  0x5e   : > { %s1360_s27 = sshll.u32 %s205_s23, 7  ;;  %s206_s30 = scalar_lea.sflag [#allocation3], %s205_s23 }
  0x5f   : > { %s1769_s3 = scalar_lea.vmem [#allocation2], %s1360_s27 }
  0x60   : > { %1590 = dma.done.wait (%p1713_p6), %s206_s30, 2048  }
  0x61   : > { %1592 = vsyncadd (%p1713_p6), %s206_s30, 4294965248  ;;  %s215_s29 = scalar_lea.sflag [#allocation6], %s205_s23  ;;  %s1775_s4 = scalar_lea.vmem [#allocation5], %s1360_s27 }
  0x62   : > { %1594 = dma.done.wait (%p1713_p6), %s215_s29, 2048  }
  0x63   : > { %1596 = vsyncadd (%p1713_p6), %s215_s29, 4294965248  ;;  %s241_s5 = sand.u32 1, %s1612_s10   ;;  %v2317_v0 = vlaneseq  ;;  %s1378_s6 = sshll.u32 %s1628_s14, 5  ;;  %v1644_v2 = vmov 0.0   ;;  %v1800_v3 = vld [vmem:[%s1769_s3] sm:$0xf] }
  0x64   : > { %s1362_s21 = sshll.u32 %s241_s5, 2  ;;  %s1787_s7 = sadd.s32 32, %s1378_s6  ;;  %v1803_v4 = vld [vmem:[%s1769_s3 + $0x4] sm:$0xf]  ;;  %v1806_v5 = vld [vmem:[%s1775_s4] sm:$0xf] }
  0x65   : > { %vm1790_vm0 = vcmp.lt.s32.totalorder %v2317_v0, 512  ;;  %s1794_s8 = scalar_lea.vmem [#allocation7], %s1362_s21  ;;  %v1809_v6 = vld [vmem:[%s1769_s3 + $0x8] sm:$0xf]  ;;  %v1812_v7 = vld [vmem:[%s1769_s3 + $0xc] sm:$0xf]  ;;  %v331_v41 = vsub.f32 %v1800_v3, %v1806_v5 }
  0x66   : > { %266 = vst.msk [vmem:[%s1794_s8] sm:$0xf] %vm1790_vm0, %v1644_v2  ;;  %v1815_v8 = vld [vmem:[%s1769_s3 + $0x10] sm:$0xf]  ;;  %v1818_v9 = vld [vmem:[%s1769_s3 + $0x14] sm:$0xf] }
  0x67   : > { %v1821_v10 = vld [vmem:[%s1775_s4 + $0x4] sm:$0xf]  ;;  %v1824_v11 = vld [vmem:[%s1775_s4 + $0x8] sm:$0xf]  ;;  %v1827_v12 = vld [vmem:[%s1775_s4 + $0xc] sm:$0xf] }
  0x68   : > { %v1830_v13 = vld [vmem:[%s1769_s3 + $0x18] sm:$0xf]  ;;  %v1833_v14 = vld [vmem:[%s1769_s3 + $0x1c] sm:$0xf]  ;;  %v1836_v15 = vld [vmem:[%s1769_s3 + $0x20] sm:$0xf]  ;;  %v332_v42 = vsub.f32 %v1803_v4, %v1821_v10  ;;  %v333_v49 = vsub.f32 %v1809_v6, %v1824_v11  ;;  %v334_v50 = vsub.f32 %v1812_v7, %v1827_v12 }
  0x69   : > { %v1839_v16 = vld [vmem:[%s1769_s3 + $0x24] sm:$0xf]  ;;  %v1842_v17 = vld [vmem:[%s1775_s4 + $0x10] sm:$0xf]  ;;  %v1845_v18 = vld [vmem:[%s1775_s4 + $0x14] sm:$0xf] }
  0x6a   : > { %v1848_v19 = vld [vmem:[%s1775_s4 + $0x18] sm:$0xf]  ;;  %v1851_v20 = vld [vmem:[%s1769_s3 + $0x28] sm:$0xf]  ;;  %v1854_v21 = vld [vmem:[%s1769_s3 + $0x2c] sm:$0xf]  ;;  %v335_v51 = vsub.f32 %v1815_v8, %v1842_v17  ;;  %v336_v52 = vsub.f32 %v1818_v9, %v1845_v18 }
  0x6b   : > { %v1857_v22 = vld [vmem:[%s1769_s3 + $0x30] sm:$0xf]  ;;  %v1860_v23 = vld [vmem:[%s1769_s3 + $0x34] sm:$0xf]  ;;  %v1863_v24 = vld [vmem:[%s1775_s4 + $0x1c] sm:$0xf]  ;;  %v337_v57 = vsub.f32 %v1830_v13, %v1848_v19 }
  0x6c   : > { %v1866_v25 = vld [vmem:[%s1775_s4 + $0x20] sm:$0xf]  ;;  %v1869_v26 = vld [vmem:[%s1775_s4 + $0x24] sm:$0xf]  ;;  %v1872_v27 = vld [vmem:[%s1769_s3 + $0x38] sm:$0xf]  ;;  %v338_v58 = vsub.f32 %v1833_v14, %v1863_v24 }
  0x6d   : > { %v1875_v28 = vld [vmem:[%s1769_s3 + $0x3c] sm:$0xf]  ;;  %v1878_v29 = vld [vmem:[%s1769_s3 + $0x40] sm:$0xf]  ;;  %v1881_v30 = vld [vmem:[%s1769_s3 + $0x44] sm:$0xf]  ;;  %v339_v59 = vsub.f32 %v1836_v15, %v1866_v25  ;;  %v340_v60 = vsub.f32 %v1839_v16, %v1869_v26 }
  0x6e   : > { %v1884_v31 = vld [vmem:[%s1775_s4 + $0x28] sm:$0xf]  ;;  %v1887_v32 = vld [vmem:[%s1775_s4 + $0x2c] sm:$0xf]  ;;  %v1890_v33 = vld [vmem:[%s1775_s4 + $0x30] sm:$0xf] }
  0x6f   : > { %v1893_v34 = vld [vmem:[%s1769_s3 + $0x48] sm:$0xf]  ;;  %v1896_v35 = vld [vmem:[%s1769_s3 + $0x4c] sm:$0xf]  ;;  %v1899_v36 = vld [vmem:[%s1769_s3 + $0x50] sm:$0xf]  ;;  %v341_v2 = vsub.f32 %v1851_v20, %v1884_v31  ;;  %v342_v3 = vsub.f32 %v1854_v21, %v1887_v32  ;;  %v343_v4 = vsub.f32 %v1857_v22, %v1890_v33 }
  0x70   : > { %v1902_v37 = vld [vmem:[%s1769_s3 + $0x54] sm:$0xf]  ;;  %v1908_v39 = vld [vmem:[%s1775_s4 + $0x38] sm:$0xf]  ;;  %v1911_v40 = vld [vmem:[%s1775_s4 + $0x3c] sm:$0xf] }
  0x71   : > { %v1905_v38 = vld [vmem:[%s1775_s4 + $0x34] sm:$0xf]  ;;  %v1918_v43 = vld [vmem:[%s1769_s3 + $0x58] sm:$0xf]  ;;  %v1921_v44 = vld [vmem:[%s1769_s3 + $0x5c] sm:$0xf]  ;;  %v345_v9 = vsub.f32 %v1872_v27, %v1908_v39  ;;  %v346_v10 = vsub.f32 %v1875_v28, %v1911_v40 }
  0x72   : > { %v1924_v45 = vld [vmem:[%s1769_s3 + $0x60] sm:$0xf]  ;;  %v1930_v47 = vld [vmem:[%s1775_s4 + $0x44] sm:$0xf]  ;;  %v1933_v48 = vld [vmem:[%s1775_s4 + $0x48] sm:$0xf]  ;;  %v344_v5 = vsub.f32 %v1860_v23, %v1905_v38 }
  0x73   : > { %v1927_v46 = vld [vmem:[%s1775_s4 + $0x40] sm:$0xf]  ;;  %v1944_v53 = vld [vmem:[%s1769_s3 + $0x64] sm:$0xf]  ;;  %v1947_v54 = vld [vmem:[%s1775_s4 + $0x4c] sm:$0xf]  ;;  %v348_v12 = vsub.f32 %v1881_v30, %v1930_v47  ;;  %v349_v16 = vsub.f32 %v1893_v34, %v1933_v48 }
  0x74   : > { %v1950_v55 = vld [vmem:[%s1775_s4 + $0x50] sm:$0xf]  ;;  %v1953_v56 = vld [vmem:[%s1775_s4 + $0x54] sm:$0xf]  ;;  %v321_v61 = vld [vmem:[%s1775_s4 + $0x58] sm:$0xf]  ;;  %v347_v11 = vsub.f32 %v1878_v29, %v1927_v46  ;;  %v350_v17 = vsub.f32 %v1896_v35, %v1947_v54 }
  0x75   : > { %v322_v62 = vld [vmem:[%s1775_s4 + $0x5c] sm:$0xf]  ;;  %v323_v63 = vld [vmem:[%s1775_s4 + $0x60] sm:$0xf]  ;;  %v293_v6 = vld [vmem:[%s1769_s3 + $0x68] sm:$0xf]  ;;  %v351_v18 = vsub.f32 %v1899_v36, %v1950_v55  ;;  %v352_v19 = vsub.f32 %v1902_v37, %v1953_v56  ;;  %v353_v23 = vsub.f32 %v1918_v43, %v321_v61 }
  0x76   : > { %v294_v7 = vld [vmem:[%s1769_s3 + $0x6c] sm:$0xf]  ;;  %v324_v8 = vld [vmem:[%s1775_s4 + $0x64] sm:$0xf]  ;;  %v295_v13 = vld [vmem:[%s1769_s3 + $0x70] sm:$0xf]  ;;  %v354_v24 = vsub.f32 %v1921_v44, %v322_v62  ;;  %v355_v25 = vsub.f32 %v1924_v45, %v323_v63 }
  0x77   : > { %v325_v14 = vld [vmem:[%s1775_s4 + $0x68] sm:$0xf]  ;;  %v326_v15 = vld [vmem:[%s1775_s4 + $0x6c] sm:$0xf]  ;;  %v296_v20 = vld [vmem:[%s1769_s3 + $0x74] sm:$0xf]  ;;  %v356_v29 = vsub.f32 %v1944_v53, %v324_v8 }
  0x78   : > { %v327_v21 = vld [vmem:[%s1775_s4 + $0x70] sm:$0xf]  ;;  %v328_v22 = vld [vmem:[%s1775_s4 + $0x74] sm:$0xf]  ;;  %v2002_v26 = vand.u32 2147483647, %v331_v41  ;;  %v357_v35 = vsub.f32 %v293_v6, %v325_v14  ;;  %v358_v39 = vsub.f32 %v294_v7, %v326_v15 }
  0x79   : > { %v297_v27 = vld [vmem:[%s1769_s3 + $0x78] sm:$0xf]  ;;  %v2007_v30 = vand.u32 2147483647, %v332_v42  ;;  %v2009_v31 = vand.u32 2147483647, %v333_v49  ;;  %v359_v43 = vsub.f32 %v295_v13, %v327_v21  ;;  %v360_v47 = vsub.f32 %v296_v20, %v328_v22 }
  0x7a   : > { %v329_v28 = vld [vmem:[%s1775_s4 + $0x78] sm:$0xf]  ;;  %v2011_v32 = vand.u32 2147483647, %v334_v50  ;;  %v298_v33 = vld [vmem:[%s1769_s3 + $0x7c] sm:$0xf] }
  0x7b   : > { %v330_v34 = vld [vmem:[%s1775_s4 + $0x7c] sm:$0xf]  ;;  %v2015_v36 = vand.u32 2147483647, %v335_v51  ;;  %v2017_v37 = vand.u32 2147483647, %v336_v52  ;;  %v361_v51 = vsub.f32 %v297_v27, %v329_v28 }
  0x7c   : > { %v2019_v38 = vand.u32 2147483647, %v337_v57  ;;  %v2021_v40 = vand.u32 2147483647, %v338_v58  ;;  %v2023_v41 = vand.u32 2147483647, %v339_v59  ;;  %v362_v55 = vsub.f32 %v298_v33, %v330_v34 }
  0x7d   : > { %v2025_v42 = vand.u32 2147483647, %v340_v60  ;;  %v2027_v44 = vand.u32 2147483647, %v341_v2  ;;  %v2029_v45 = vand.u32 2147483647, %v342_v3 }
  0x7e   : > { %v2031_v46 = vand.u32 2147483647, %v343_v4  ;;  %v2033_v48 = vand.u32 2147483647, %v344_v5  ;;  %v2035_v49 = vand.u32 2147483647, %v345_v9 }
  0x7f   : > { %v2037_v50 = vand.u32 2147483647, %v346_v10  ;;  %v2039_v52 = vand.u32 2147483647, %v347_v11  ;;  %v2041_v53 = vand.u32 2147483647, %v348_v12 }
  0x80   : > { %v2043_v54 = vand.u32 2147483647, %v349_v16  ;;  %v2045_v56 = vand.u32 2147483647, %v350_v17  ;;  %v2047_v57 = vand.u32 2147483647, %v351_v18 }
  0x81   : > { %v2049_v58 = vand.u32 2147483647, %v352_v19  ;;  %v2051_v59 = vand.u32 2147483647, %v353_v23  ;;  %v2053_v60 = vand.u32 2147483647, %v354_v24 }
  0x82   : > { %v2055_v61 = vand.u32 2147483647, %v355_v25  ;;  %v2057_v62 = vand.u32 2147483647, %v356_v29  ;;  %v2059_v63 = vand.u32 2147483647, %v357_v35 }
  0x83   : > { %v2061_v2 = vand.u32 2147483647, %v358_v39  ;;  %v2063_v3 = vand.u32 2147483647, %v359_v43  ;;  %v2065_v4 = vand.u32 2147483647, %v360_v47 }
  0x84   : > { %2331 = vst [vmem:[#allocation11_spill] sm:$0xff] %v2055_v61  ;;  %2332 = vst [vmem:[#allocation12_spill] sm:$0xff] %v2059_v63  ;;  %v2067_v5 = vand.u32 2147483647, %v361_v51  ;;  %v2069_v6 = vand.u32 2147483647, %v362_v55 }
  0x85   : > { %2333 = vst [vmem:[#allocation13_spill] sm:$0xff] %v2061_v2  ;;  %2334 = vst [vmem:[#allocation14_spill] sm:$0xff] %v2063_v3  ;;  %p1364_p6 = scmp.gt.s32.totalorder %s1787_s7, 1 }
  0x86   : > { %2335 = vst [vmem:[#allocation15_spill] sm:$0xff] %v2065_v4  ;;  %2336 = vst [vmem:[#allocation16_spill] sm:$0xff] %v2067_v5  ;;  %v1645_v7 = vmov (!%p1364_p6), 1966171168   ;;  %v443_v9 = vshrl.u32 (!%p1364_p6), %v2317_v0, 7  ;;  %v435_v10 = vcombine.low (!%p1364_p6), %v2002_v26, %v2007_v30  ;;  %v436_v11 = vcombine.low (!%p1364_p6), %v2009_v31, %v2011_v32 }
  0x87   : > { %2337 = vst [vmem:[#allocation17_spill] sm:$0xff] %v2069_v6  ;;  %401 = sbr.rel (%p1364_p6) target bundleno = 186 (0xba), region = 44  ;;  %v440_v8 = vunpack.c.l.s4 (!%p1364_p6), %v1645_v7  ;;  %v437_v12 = vcombine.low (!%p1364_p6), %v2015_v36, %v2017_v37  ;;  %v438_v13 = vcombine.low (!%p1364_p6), %v2019_v38, %v2021_v40  ;;  %v503_v15 = vcombine.low (!%p1364_p6), %v2023_v41, %v2025_v42 }
  0x88   : > { %v504_v16 = vcombine.low (!%p1364_p6), %v2027_v44, %v2029_v45  ;;  %v505_v17 = vcombine.low (!%p1364_p6), %v2031_v46, %v2033_v48  ;;  %v506_v18 = vcombine.low (!%p1364_p6), %v2035_v49, %v2037_v50  ;;  %v571_v19 = vcombine.low (!%p1364_p6), %v2039_v52, %v2041_v53 }
  0x89   : > { %v441_v14 = vunpack.c.0.s8 (!%p1364_p6), %v440_v8  ;;  %v572_v21 = vcombine.low (!%p1364_p6), %v2043_v54, %v2045_v56  ;;  %v573_v22 = vcombine.low (!%p1364_p6), %v2047_v57, %v2049_v58  ;;  %v574_v23 = vcombine.low (!%p1364_p6), %v2051_v59, %v2053_v60 }
  0x8a   : > { %v639_v24 = vcombine.low (!%p1364_p6), %v2055_v61, %v2057_v62  ;;  %v640_v25 = vcombine.low (!%p1364_p6), %v2059_v63, %v2061_v2  ;;  %v641_v27 = vcombine.low (!%p1364_p6), %v2063_v3, %v2065_v4  ;;  %v642_v28 = vcombine.low (!%p1364_p6), %v2067_v5, %v2069_v6 }
  0x8b   : > { %v2091_v20 = vsub.s32 (!%p1364_p6), %v441_v14, %v443_v9 }
  0x8d   : > { %v445_v29 = vrot.slane (!%p1364_p6), %v435_v10, %v2091_v20  ;;  %v452_v33 = vrot.slane (!%p1364_p6), %v436_v11, %v2091_v20  ;;  %v459_v34 = vrot.slane (!%p1364_p6), %v437_v12, %v2091_v20  ;;  %v466_v35 = vrot.slane (!%p1364_p6), %v438_v13, %v2091_v20 }
  0x8e   : > { %v513_v39 = vrot.slane %v503_v15, %v2091_v20  ;;  %v520_v43 = vrot.slane %v504_v16, %v2091_v20  ;;  %v527_v47 = vrot.slane %v505_v17, %v2091_v20  ;;  %v534_v51 = vrot.slane %v506_v18, %v2091_v20 }
  0x8f   : > { %v467_v55 = vcombine.low %v445_v29, %v452_v33  ;;  %v468_v7 = vcombine.high %v445_v29, %v452_v33  ;;  %v469_v8 = vcombine.low %v459_v34, %v466_v35  ;;  %v470_v9 = vcombine.high %v459_v34, %v466_v35 }
  0x90   : > { %v535_v14 = vcombine.low %v513_v39, %v520_v43  ;;  %v536_v10 = vcombine.high %v513_v39, %v520_v43  ;;  %v537_v0 = vcombine.low %v527_v47, %v534_v51  ;;  %v538_v11 = vcombine.high %v527_v47, %v534_v51 }
  0x91   : > { %v477_v12 = vrot.slane %v467_v55, %v2091_v20  ;;  %v484_v13 = vrot.slane %v468_v7, %v2091_v20  ;;  %v491_v15 = vrot.slane %v469_v8, %v2091_v20  ;;  %v498_v16 = vrot.slane %v470_v9, %v2091_v20 }
  0x92   : > { %v545_v17 = vrot.slane %v535_v14, %v2091_v20  ;;  %v552_v18 = vrot.slane %v536_v10, %v2091_v20  ;;  %v559_v29 = vrot.slane %v537_v0, %v2091_v20  ;;  %v566_v33 = vrot.slane %v538_v11, %v2091_v20 }
  0x93   : > { %v499_v34 = vcombine.low %v477_v12, %v491_v15  ;;  %v500_v35 = vcombine.high %v477_v12, %v491_v15  ;;  %v501_v39 = vcombine.low %v484_v13, %v498_v16  ;;  %v502_v43 = vcombine.high %v484_v13, %v498_v16 }
  0x94   : > { %v567_v47 = vcombine.low %v545_v17, %v559_v29  ;;  %v568_v51 = vcombine.high %v545_v17, %v559_v29  ;;  %v569_v55 = vcombine.low %v552_v18, %v566_v33  ;;  %v570_v7 = vcombine.high %v552_v18, %v566_v33 }
  0x95   : > { %v581_v8 = vrot.slane %v571_v19, %v2091_v20  ;;  %v588_v9 = vrot.slane %v572_v21, %v2091_v20  ;;  %v595_v14 = vrot.slane %v573_v22, %v2091_v20  ;;  %v602_v10 = vrot.slane %v574_v23, %v2091_v20 }
  0x96   : > { %v649_v0 = vrot.slane %v639_v24, %v2091_v20  ;;  %v656_v11 = vrot.slane %v640_v25, %v2091_v20  ;;  %v663_v12 = vrot.slane %v641_v27, %v2091_v20  ;;  %v670_v13 = vrot.slane %v642_v28, %v2091_v20 }
  0x97   : > { %v603_v15 = vcombine.low %v581_v8, %v588_v9  ;;  %v604_v16 = vcombine.high %v581_v8, %v588_v9  ;;  %v605_v17 = vcombine.low %v595_v14, %v602_v10  ;;  %v606_v18 = vcombine.high %v595_v14, %v602_v10 }
  0x98   : > { %v671_v29 = vcombine.low %v649_v0, %v656_v11  ;;  %v672_v19 = vcombine.high %v649_v0, %v656_v11  ;;  %v673_v33 = vcombine.low %v663_v12, %v670_v13  ;;  %v674_v21 = vcombine.high %v663_v12, %v670_v13 }
  0x99   : > { %v613_v22 = vrot.slane %v603_v15, %v2091_v20  ;;  %v620_v23 = vrot.slane %v604_v16, %v2091_v20  ;;  %v627_v24 = vrot.slane %v605_v17, %v2091_v20  ;;  %v634_v25 = vrot.slane %v606_v18, %v2091_v20 }
  0x9a   : > { %v681_v27 = vrot.slane %v671_v29, %v2091_v20  ;;  %v688_v28 = vrot.slane %v672_v19, %v2091_v20  ;;  %v695_v8 = vrot.slane %v673_v33, %v2091_v20  ;;  %v702_v9 = vrot.slane %v674_v21, %v2091_v20 }
  0x9b   : > { %v635_v14 = vcombine.low %v613_v22, %v627_v24  ;;  %v636_v10 = vcombine.high %v613_v22, %v627_v24  ;;  %v637_v0 = vcombine.low %v620_v23, %v634_v25  ;;  %v638_v11 = vcombine.high %v620_v23, %v634_v25 }
  0x9c   : > { %v703_v12 = vcombine.low %v681_v27, %v695_v8  ;;  %v704_v13 = vcombine.high %v681_v27, %v695_v8  ;;  %v705_v15 = vcombine.low %v688_v28, %v702_v9  ;;  %v706_v16 = vcombine.high %v688_v28, %v702_v9 }
  0x9d   : > { %v723_v5 = vadd.f32 %v567_v47, %v499_v34  ;;  %v732_v17 = vadd.f32 %v569_v55, %v501_v39  ;;  %v741_v6 = vadd.f32 %v568_v51, %v500_v35  ;;  %v750_v18 = vadd.f32 %v570_v7, %v502_v43 }
  0x9f   : > { %v724_v3 = vadd.f32 %v723_v5, %v635_v14  ;;  %v733_v29 = vadd.f32 %v732_v17, %v637_v0  ;;  %v742_v4 = vadd.f32 %v741_v6, %v636_v10  ;;  %v751_v19 = vadd.f32 %v750_v18, %v638_v11 }
  0xa1   : > { %v725_v63 = vadd.f32 %v724_v3, %v703_v12  ;;  %v734_v33 = vadd.f32 %v733_v29, %v705_v15  ;;  %v743_v2 = vadd.f32 %v742_v4, %v704_v13  ;;  %v752_v21 = vadd.f32 %v751_v19, %v706_v16  ;;  %v402_v13 = vld [vmem:[%s1794_s8] sm:$0xf] }
  0xa3   : > { %v726_v61 = vrot.slane %v725_v63, 4  ;;  %v735_v22 = vrot.slane %v734_v33, 4  ;;  %v744_v24 = vrot.slane %v743_v2, 4  ;;  %v753_v23 = vrot.slane %v752_v21, 4 }
  0xa5   : > { %v727_v25 = vadd.f32 %v726_v61, %v725_v63  ;;  %v736_v27 = vadd.f32 %v735_v22, %v734_v33  ;;  %v745_v8 = vadd.f32 %v744_v24, %v743_v2  ;;  %v754_v28 = vadd.f32 %v753_v23, %v752_v21 }
  0xa7   : > { %v728_v34 = vrot.slane %v727_v25, 2  ;;  %v737_v39 = vrot.slane %v736_v27, 2  ;;  %v746_v35 = vrot.slane %v745_v8, 2  ;;  %v755_v43 = vrot.slane %v754_v28, 2 }
  0xa9   : > { %v729_v5 = vadd.f32 %v728_v34, %v727_v25  ;;  %v738_v47 = vadd.f32 %v737_v39, %v736_v27  ;;  %v747_v6 = vadd.f32 %v746_v35, %v745_v8  ;;  %v756_v3 = vadd.f32 %v755_v43, %v754_v28 }
  0xab   : > { %v730_v51 = vrot.slane %v729_v5, 1  ;;  %v739_v4 = vrot.slane %v738_v47, 1  ;;  %v748_v55 = vrot.slane %v747_v6, 1  ;;  %v757_v7 = vrot.slane %v756_v3, 1 }
  0xad   : > { %v731_v9 = vadd.f32 %v730_v51, %v729_v5  ;;  %v740_v14 = vadd.f32 %v739_v4, %v738_v47  ;;  %v749_v61 = vadd.f32 %v748_v55, %v747_v6  ;;  %v758_v63 = vadd.f32 %v757_v7, %v756_v3 }
  0xaf   : > { %v763_v2 = vcombine.low %v731_v9, %v740_v14  ;;  %v764_v10 = vcombine.low %v749_v61, %v758_v63 }
  0xb1   : > { %v771_v0 = vrot.slane %v763_v2, %v2091_v20  ;;  %v778_v11 = vrot.slane %v764_v10, %v2091_v20 }
  0xb3   : > { %v779_v12 = vcombine.low %v771_v0, %v778_v11 }
  0xb5   : > { %v786_v15 = vrot.slane %v779_v12, %v2091_v20 }
  0xb7   : > { %v788_v16 = vadd.f32 %v786_v15, %v402_v13 }
  0xb9   : > { %793 = vst.msk [vmem:[%s1794_s8] sm:$0xf] %vm1790_vm0, %v788_v16 }
  0xba PF: > { %p1365_p2 = scmp.le.s32.totalorder %s1787_s7, 1 }
  0xbb   : > { %v2338_v17 = vlaneseq (!%p1365_p2)  ;;  %v804_v29 = vstv (!%p1365_p2), %s1378_s6  ;;  %v845_v22 = vcombine.low (!%p1365_p2), %v2002_v26, %v2007_v30  ;;  %v846_v20 = vcombine.low (!%p1365_p2), %v2009_v31, %v2011_v32  ;;  %v2343_v35 = vld [vmem:[#allocation14_spill] sm:$0xff] (!%p1365_p2)  ;;  %v2345_v43 = vld [vmem:[#allocation16_spill] sm:$0xff] (!%p1365_p2) }
  0xbc   : > { %797 = sbr.rel (%p1365_p2) target bundleno = 244 (0xf4), region = 48  ;;  %v1646_v24 = vmov (!%p1365_p2), 1966171168   ;;  %v847_v27 = vcombine.low (!%p1365_p2), %v2015_v36, %v2017_v37  ;;  %v848_v8 = vcombine.low (!%p1365_p2), %v2019_v38, %v2021_v40  ;;  %v913_v28 = vcombine.low (!%p1365_p2), %v2023_v41, %v2025_v42 }
  0xbd   : > { %v799_v18 = vshrl.u32 (!%p1365_p2), %v2338_v17, 7  ;;  %v850_v23 = vunpack.c.l.s4 (!%p1365_p2), %v1646_v24  ;;  %v914_v26 = vcombine.low (!%p1365_p2), %v2027_v44, %v2029_v45  ;;  %v915_v30 = vcombine.low (!%p1365_p2), %v2031_v46, %v2033_v48  ;;  %v2339_v44 = vld [vmem:[#allocation11_spill] sm:$0xff] (!%p1365_p2)  ;;  %v2340_v46 = vld [vmem:[#allocation13_spill] sm:$0xff] (!%p1365_p2)  ;;  %v2341_v48 = vld [vmem:[#allocation12_spill] sm:$0xff] (!%p1365_p2) }
  0xbe   : > { %v916_v31 = vcombine.low (!%p1365_p2), %v2035_v49, %v2037_v50  ;;  %v981_v37 = vcombine.low (!%p1365_p2), %v2039_v52, %v2041_v53  ;;  %v982_v40 = vcombine.low (!%p1365_p2), %v2043_v54, %v2045_v56  ;;  %v983_v41 = vcombine.low (!%p1365_p2), %v2047_v57, %v2049_v58  ;;  %v2342_v50 = vld [vmem:[#allocation15_spill] sm:$0xff] (!%p1365_p2)  ;;  %v2344_v53 = vld [vmem:[#allocation17_spill] sm:$0xff] (!%p1365_p2) }
  0xbf   : > { %v800_v19 = vadd.s32 (!%p1365_p2), 8, %v799_v18  ;;  %v801_v33 = vadd.s32 (!%p1365_p2), 16, %v799_v18  ;;  %v802_v21 = vadd.s32 (!%p1365_p2), 24, %v799_v18  ;;  %v2154_v25 = vadd.s32 (!%p1365_p2), %v804_v29, %v799_v18 }
  0xc0   : > { %v851_v34 = vunpack.c.0.s8 (!%p1365_p2), %v850_v23  ;;  %v984_v42 = vcombine.low (!%p1365_p2), %v2051_v59, %v2053_v60  ;;  %v1049_v45 = vcombine.low (!%p1365_p2), %v2339_v44, %v2057_v62  ;;  %v1050_v49 = vcombine.low (!%p1365_p2), %v2341_v48, %v2340_v46 }
  0xc1   : > { %v2168_v32 = vadd.s32 (!%p1365_p2), %v804_v29, %v800_v19  ;;  %v2170_v39 = vadd.s32 (!%p1365_p2), %v804_v29, %v801_v33  ;;  %v2172_v36 = vadd.s32 (!%p1365_p2), %v804_v29, %v802_v21  ;;  %v1051_v52 = vcombine.low (!%p1365_p2), %v2343_v35, %v2342_v50 }
  0xc2   : > { %v2176_v38 = vsub.s32 (!%p1365_p2), %v851_v34, %v799_v18  ;;  %v1052_v5 = vcombine.low (!%p1365_p2), %v2345_v43, %v2344_v53  ;;  %vm809_vm1 = vcmp.lt.s32.totalorder (!%p1365_p2), %v2154_v25, 1 }
  0xc3   : > { %vm810_vm2 = vcmp.lt.s32.totalorder %v2168_v32, 1  ;;  %vm811_vm3 = vcmp.lt.s32.totalorder %v2170_v39, 1  ;;  %vm812_vm4 = vcmp.lt.s32.totalorder %v2172_v36, 1 }
  0xc4   : > { %v855_v54 = vrot.slane %v845_v22, %v2176_v38  ;;  %v862_v56 = vrot.slane %v846_v20, %v2176_v38  ;;  %v869_v57 = vrot.slane %v847_v27, %v2176_v38  ;;  %v876_v58 = vrot.slane %v848_v8, %v2176_v38 }
  0xc5   : > { %v923_v59 = vrot.slane %v913_v28, %v2176_v38  ;;  %v930_v60 = vrot.slane %v914_v26, %v2176_v38  ;;  %v937_v62 = vrot.slane %v915_v30, %v2176_v38  ;;  %v944_v47 = vrot.slane %v916_v31, %v2176_v38 }
  0xc6   : > { %v877_v6 = vcombine.low %v855_v54, %v862_v56  ;;  %v878_v3 = vcombine.high %v855_v54, %v862_v56  ;;  %v879_v51 = vcombine.low %v869_v57, %v876_v58  ;;  %v880_v4 = vcombine.high %v869_v57, %v876_v58 }
  0xc7   : > { %v945_v55 = vcombine.low %v923_v59, %v930_v60  ;;  %v946_v7 = vcombine.high %v923_v59, %v930_v60  ;;  %v947_v9 = vcombine.low %v937_v62, %v944_v47  ;;  %v948_v14 = vcombine.high %v937_v62, %v944_v47 }
  0xc8   : > { %v887_v61 = vrot.slane %v877_v6, %v2176_v38  ;;  %v894_v63 = vrot.slane %v878_v3, %v2176_v38  ;;  %v901_v2 = vrot.slane %v879_v51, %v2176_v38  ;;  %v908_v10 = vrot.slane %v880_v4, %v2176_v38 }
  0xc9   : > { %v955_v0 = vrot.slane %v945_v55, %v2176_v38  ;;  %v962_v11 = vrot.slane %v946_v7, %v2176_v38  ;;  %v969_v12 = vrot.slane %v947_v9, %v2176_v38  ;;  %v976_v13 = vrot.slane %v948_v14, %v2176_v38 }
  0xca   : > { %v909_v15 = vcombine.low %v887_v61, %v901_v2  ;;  %v910_v16 = vcombine.high %v887_v61, %v901_v2  ;;  %v911_v17 = vcombine.low %v894_v63, %v908_v10  ;;  %v912_v18 = vcombine.high %v894_v63, %v908_v10 }
  0xcb   : > { %v977_v29 = vcombine.low %v955_v0, %v969_v12  ;;  %v978_v19 = vcombine.high %v955_v0, %v969_v12  ;;  %v979_v33 = vcombine.low %v962_v11, %v976_v13  ;;  %v980_v21 = vcombine.high %v962_v11, %v976_v13 }
  0xcc   : > { %v991_v22 = vrot.slane %v981_v37, %v2176_v38  ;;  %v998_v20 = vrot.slane %v982_v40, %v2176_v38  ;;  %v1005_v24 = vrot.slane %v983_v41, %v2176_v38  ;;  %v1012_v23 = vrot.slane %v984_v42, %v2176_v38 }
  0xcd   : > { %v1059_v27 = vrot.slane %v1049_v45, %v2176_v38  ;;  %v1066_v8 = vrot.slane %v1050_v49, %v2176_v38  ;;  %v1073_v28 = vrot.slane %v1051_v52, %v2176_v38  ;;  %v1080_v34 = vrot.slane %v1052_v5, %v2176_v38 }
  0xce   : > { %v1013_v26 = vcombine.low %v991_v22, %v998_v20  ;;  %v1014_v30 = vcombine.high %v991_v22, %v998_v20  ;;  %v1015_v31 = vcombine.low %v1005_v24, %v1012_v23  ;;  %v1016_v44 = vcombine.high %v1005_v24, %v1012_v23 }
  0xcf   : > { %v1081_v46 = vcombine.low %v1059_v27, %v1066_v8  ;;  %v1082_v37 = vcombine.high %v1059_v27, %v1066_v8  ;;  %v1083_v48 = vcombine.low %v1073_v28, %v1080_v34  ;;  %v1084_v40 = vcombine.high %v1073_v28, %v1080_v34 }
  0xd0   : > { %v1023_v41 = vrot.slane %v1013_v26, %v2176_v38  ;;  %v1030_v42 = vrot.slane %v1014_v30, %v2176_v38  ;;  %v1037_v45 = vrot.slane %v1015_v31, %v2176_v38  ;;  %v1044_v49 = vrot.slane %v1016_v44, %v2176_v38 }
  0xd1   : > { %v1091_v50 = vrot.slane %v1081_v46, %v2176_v38  ;;  %v1098_v35 = vrot.slane %v1082_v37, %v2176_v38  ;;  %v1105_v52 = vrot.slane %v1083_v48, %v2176_v38  ;;  %v1112_v53 = vrot.slane %v1084_v40, %v2176_v38 }
  0xd2   : > { %v1045_v43 = vcombine.low %v1023_v41, %v1037_v45  ;;  %v1046_v5 = vcombine.high %v1023_v41, %v1037_v45  ;;  %v1047_v54 = vcombine.low %v1030_v42, %v1044_v49  ;;  %v1048_v56 = vcombine.high %v1030_v42, %v1044_v49 }
  0xd3   : > { %v1113_v57 = vcombine.low %v1091_v50, %v1105_v52  ;;  %v1114_v58 = vcombine.high %v1091_v50, %v1105_v52  ;;  %v1115_v59 = vcombine.low %v1098_v35, %v1112_v53  ;;  %v1116_v60 = vcombine.high %v1098_v35, %v1112_v53 }
  0xd4   : > { %v1133_v62 = vsel %vm809_vm1, %v909_v15, 0.0  ;;  %v1134_v47 = vsel %vm809_vm1, %v911_v17, 0.0  ;;  %v1135_v6 = vsel %vm809_vm1, %v910_v16, 0.0  ;;  %v1136_v3 = vsel %vm809_vm1, %v912_v18, 0.0 }
  0xd5   : > { %v1137_v51 = vsel %vm810_vm2, %v977_v29, 0.0  ;;  %v1138_v4 = vsel %vm810_vm2, %v979_v33, 0.0  ;;  %v1139_v55 = vsel %vm810_vm2, %v978_v19, 0.0  ;;  %v1140_v7 = vsel %vm810_vm2, %v980_v21, 0.0 }
  0xd6   : > { %v1141_v9 = vsel %vm811_vm3, %v1045_v43, 0.0  ;;  %v1142_v25 = vsel %vm811_vm3, %v1047_v54, 0.0  ;;  %v1143_v14 = vsel %vm811_vm3, %v1046_v5, 0.0  ;;  %v1144_v61 = vsel %vm811_vm3, %v1048_v56, 0.0  ;;  %v1149_v56 = vld [vmem:[%s1794_s8] sm:$0xf] }
  0xd7   : > { %v1150_v63 = vadd.f32 %v1137_v51, %v1133_v62  ;;  %v1159_v2 = vadd.f32 %v1138_v4, %v1134_v47  ;;  %v1168_v10 = vadd.f32 %v1139_v55, %v1135_v6  ;;  %v1177_v0 = vadd.f32 %v1140_v7, %v1136_v3 }
  0xd8   : > { %v1145_v32 = vsel %vm812_vm4, %v1113_v57, 0.0  ;;  %v1146_v11 = vsel %vm812_vm4, %v1115_v59, 0.0  ;;  %v1147_v12 = vsel %vm812_vm4, %v1114_v58, 0.0  ;;  %v1148_v36 = vsel %vm812_vm4, %v1116_v60, 0.0 }
  0xd9   : > { %v1151_v13 = vadd.f32 %v1150_v63, %v1141_v9  ;;  %v1160_v15 = vadd.f32 %v1159_v2, %v1142_v25  ;;  %v1169_v16 = vadd.f32 %v1168_v10, %v1143_v14  ;;  %v1178_v17 = vadd.f32 %v1177_v0, %v1144_v61 }
  0xdb   : > { %v1152_v18 = vadd.f32 %v1151_v13, %v1145_v32  ;;  %v1161_v29 = vadd.f32 %v1160_v15, %v1146_v11  ;;  %v1170_v19 = vadd.f32 %v1169_v16, %v1147_v12  ;;  %v1179_v33 = vadd.f32 %v1178_v17, %v1148_v36 }
  0xdd   : > { %v1153_v21 = vrot.slane %v1152_v18, 4  ;;  %v1162_v22 = vrot.slane %v1161_v29, 4  ;;  %v1171_v39 = vrot.slane %v1170_v19, 4  ;;  %v1180_v20 = vrot.slane %v1179_v33, 4 }
  0xdf   : > { %v1154_v24 = vadd.f32 %v1153_v21, %v1152_v18  ;;  %v1163_v23 = vadd.f32 %v1162_v22, %v1161_v29  ;;  %v1172_v27 = vadd.f32 %v1171_v39, %v1170_v19  ;;  %v1181_v8 = vadd.f32 %v1180_v20, %v1179_v33 }
  0xe1   : > { %v1155_v28 = vrot.slane %v1154_v24, 2  ;;  %v1164_v34 = vrot.slane %v1163_v23, 2  ;;  %v1173_v26 = vrot.slane %v1172_v27, 2  ;;  %v1182_v30 = vrot.slane %v1181_v8, 2 }
  0xe3   : > { %v1156_v31 = vadd.f32 %v1155_v28, %v1154_v24  ;;  %v1165_v44 = vadd.f32 %v1164_v34, %v1163_v23  ;;  %v1174_v46 = vadd.f32 %v1173_v26, %v1172_v27  ;;  %v1183_v37 = vadd.f32 %v1182_v30, %v1181_v8 }
  0xe5   : > { %v1157_v48 = vrot.slane %v1156_v31, 1  ;;  %v1166_v40 = vrot.slane %v1165_v44, 1  ;;  %v1175_v41 = vrot.slane %v1174_v46, 1  ;;  %v1184_v42 = vrot.slane %v1183_v37, 1 }
  0xe7   : > { %v1158_v45 = vadd.f32 %v1157_v48, %v1156_v31  ;;  %v1167_v49 = vadd.f32 %v1166_v40, %v1165_v44  ;;  %v1176_v50 = vadd.f32 %v1175_v41, %v1174_v46  ;;  %v1185_v35 = vadd.f32 %v1184_v42, %v1183_v37 }
  0xe9   : > { %v1190_v52 = vcombine.low %v1158_v45, %v1167_v49  ;;  %v1191_v53 = vcombine.low %v1176_v50, %v1185_v35 }
  0xeb   : > { %v1198_v43 = vrot.slane %v1190_v52, %v2176_v38  ;;  %v1205_v5 = vrot.slane %v1191_v53, %v2176_v38 }
  0xed   : > { %v1206_v54 = vcombine.low %v1198_v43, %v1205_v5 }
  0xef   : > { %v1213_v57 = vrot.slane %v1206_v54, %v2176_v38 }
  0xf1   : > { %v1215_v58 = vadd.f32 %v1213_v57, %v1149_v56 }
  0xf3   : > { %1220 = vst.msk [vmem:[%s1794_s8] sm:$0xf] %vm1790_vm0, %v1215_v58 }
  0xf4 PF: > { %s1380_s20 = sshll.u32 %s1628_s14, 6  ;;  %s1236_s18 = sshll.u32 %s1794_s8, 4  ;;  %s1237_s18 = int_to_ptr.vmem [resolvable:$true] %s1236_s18 }
  0xf5   : > { %s2263_s17 = scalar_lea.hbm %s2315_s2, %s1380_s20  ;;  %s1222_s22 = scalar_lea.sflag [#allocation4], %s241_s5 }
  0xf6   : > { %s1525_s23 = scalar_lea.vmem %s1237_s18, 64  ;;  %s1647_s27 = smov [#allocation7]  }
  0xf7   : > { %p1526_p3 = scmp.ne.s32.totalorder %s1237_s18, %s1525_s23  ;;  %s1529_s30 = sshll.u32 %s1647_s27, 4  ;;  %s1530_s30 = int_to_ptr.vmem [resolvable:$false] %s1529_s30 }
  0xf8   : > { %s1531_s3 = scalar_lea.vmem %s1530_s30, 128  ;;  %p1532_p7 = scmp.lt.s32.totalorder %s1237_s18, %s1530_s30 }
  0xf9   : > { %p1527_p5 = pnand %p1526_p3, %p1727_p12  ;;  %p1533_p8 = scmp.lt.s32.totalorder %s1531_s3, %s1525_s23 }
  0xfb   : > { %p1528_p4 = pneg %p1527_p5  ;;  %p1534_p9 = por %p1533_p8, %p1532_p7 }
  0xfd   : > { %p1535_p10 = pnand %p1534_p9, %p1528_p4 }
  0xff   : > { %1538 = shalt.err (!%p1535_p10)
}
 0x100   : > { %s1539_s14 = scalar_lea.hbm %s2263_s17, 64  ;;  %s1543_s5 = scalar_lea.hbm %s2315_s2, 128 }
 0x101   : > { %p1540_p11 = scmp.ne.s32.totalorder %s2263_s17, %s1539_s14  ;;  %p1544_p6 = scmp.lt.u32.totalorder %s2263_s17, %s2315_s2 }
 0x102   : > { %p1545_p2 = scmp.lt.u32.totalorder %s1543_s5, %s1539_s14  ;;  %p1547_p5 = scmp.lt.u32.totalorder %s1539_s14, %s2263_s17 }
 0x103   : > { %p1541_p0 = pnand %p1540_p11, %p1727_p12 }
 0x104   : > { %p1546_p3 = por %p1545_p2, %p1544_p6 }
 0x105   : > { %p1542_p1 = pneg %p1541_p0 }
 0x106   : > { %p1548_p4 = por %p1547_p5, %p1546_p3 }
 0x108   : > { %p1549_p7 = pnand %p1548_p4, %p1542_p1 }
 0x10a   : > { %1552 = shalt.err (!%p1549_p7)
}
 0x10b   : > { %1383 = dma.vmem_to_hbm [thread:$0]  (%p1727_p12), %s1237_s18, 64, %s2263_s17, %s1222_s22  }
 0x10c PF: > { %s1248_s7 = sand.u32 1, %s1608_s9   ;;  %p2346_p8 = scmp.ge.s32.totalorder %s1636_s16, 2 }
 0x10d   : > { %s1249_s8 = scalar_lea.sflag [#allocation4], %s1248_s7 }
 0x10e   : > { %p1386_p9 = pnand %p2346_p8, %p1731_p13 }
 0x110   : > { %1598 = dma.done.wait (!%p1386_p9), %s1249_s8, 64  }
 0x111   : > { %1600 = vsyncadd (!%p1386_p9), %s1249_s8, 4294967232  ;;  %s21_s16 = sadd.s32 1, %s1636_s16   ;;  %s2347_s9 = smov %s1612_s10 }
 0x112   : > { %p18_p10 = scmp.ge.s32.totalorder %s21_s16, 4   ;;  %s2348_s10 = smov %s1616_s11 }
 0x113   : > { %s2349_s11 = smov %s1721_s24  ;;  %s2350_s12 = smov %s1624_s13 }
 0x114   : > { %s2303_s13 = smov 0   ;;  %s2351_s14 = smov %s1632_s15 }
 0x115   : > { %s2352_s15 = smov %s2354_s19  ;;  %20 = sbr.rel (!%p18_p10) target bundleno = 9 (0x9), region = 98 }
 0x11c   :  { %1254 = vsyncpa [#allocation3], 1 }
 0x11d   :  { %1256 = vsyncpa [#allocation3 + $0x1], 1 }
 0x11e   :  { %1257 = vsyncpa [#allocation6], 1 }
 0x11f   :  { %1259 = vsyncpa [#allocation6 + $0x1], 1 }
 0x120   :  { %1260 = vsyncpa [#allocation4], 1 }
 0x121   :  { %1262 = vsyncpa [#allocation4 + $0x1], 1 }

</bundles_post_ra>
